<compile_context>
chip_gen: v6e
topology: v6e:2x2x1
jax: 0.10.0
libtpu: 0.0.40
codegen_flags: <defaults>
</compile_context>

<pallas_src>
import functools

import jax
import jax.numpy as jnp
from jax.experimental import pallas as pl
from jax.experimental.pallas import tpu as pltpu

LANE = 128
SUBLANE = 8


def _round_up(x, m):
    return (x + m - 1) // m * m


# ----------------------------------------------------------------------------
# Fused Pallas kernel: full GraphCNN forward (eval mode)
# ----------------------------------------------------------------------------
def graphcnn_fused_kernel(eps_ref,            # SMEM [L-1]            f32
                          adj_ref,            # VMEM [Np, Np]         bf16
                          pool_ref,           # VMEM [Bp, Np]         bf16
                          x_ref,              # VMEM [Np, P]          bf16
                          w1_ref, b1_ref,     # VMEM [L-1,P,P] bf16 / [L-1,1,P] f32
                          w2_ref, b2_ref,     # VMEM [L-1,P,P] bf16 / [L-1,1,P] f32
                          wp_ref, bp_ref,     # VMEM [L*P, Op] bf16 / [1, Op]   f32
                          out_ref):           # VMEM [Bp, Op]         f32
    """score = [g_0 | g_1 | g_2] @ Wp_stacked + sum(bp), where g_l = pool @ h_l and
       h_{l+1} = ReLU(BN_out(Linear2(ReLU(BN1(Linear1(Adj@h_l + (1+eps_l)*h_l))))))
       BatchNorms are folded into the Linear weights/biases; dropout = identity (eval)."""
    num_gin_layers = w1_ref.shape[0]

    adj = adj_ref[...]                                    # bf16 [Np, Np]
    pool = pool_ref[...]                                  # bf16 [Bp, Np]
    h = x_ref[...]                                        # bf16 [Np, P]  (single live copy)

    # per-layer graph readouts g_l = pool @ h_l  (hidden_rep[0] = X_concat)
    g_parts = [jnp.dot(pool, h, preferred_element_type=jnp.float32)]   # [Bp, P]

    for l in range(num_gin_layers):        # statically unrolled (L-1 = 2)
        # neighbor sum-pool + learned-eps self term (f32 accumulate)
        pooled = jnp.dot(adj, h, preferred_element_type=jnp.float32)
        pooled = pooled + (1.0 + eps_ref[l]) * h.astype(jnp.float32)

        # MLP hidden layer: Linear1 (internal BN pre-folded) + ReLU
        z = jnp.dot(pooled.astype(jnp.bfloat16), w1_ref[l],
                    preferred_element_type=jnp.float32) + b1_ref[l]
        z = jnp.maximum(z, 0.0)

        # MLP output Linear2 (outer BatchNorm pre-folded) + ReLU
        z = jnp.dot(z.astype(jnp.bfloat16), w2_ref[l],
                    preferred_element_type=jnp.float32) + b2_ref[l]
        z = jnp.maximum(z, 0.0)
        h = z.astype(jnp.bfloat16)

        g_parts.append(jnp.dot(pool, h, preferred_element_type=jnp.float32))

    # Fused prediction head: one [Bp, L*P] x [L*P, Op] dot + one bias add.
    g_all = jnp.concatenate(g_parts, axis=-1).astype(jnp.bfloat16)     # [Bp, L*P]
    out_ref[...] = jnp.dot(g_all, wp_ref[...],
                           preferred_element_type=jnp.float32) + bp_ref[...]


# ----------------------------------------------------------------------------
# Wrapper
# ----------------------------------------------------------------------------
def graphcnn_forward(x, adj, graph_pool, params, *, output_dim):
    """x: [N, Din] f32, adj: dense [N, N] f32, graph_pool: [B, N] f32."""
    N, din = x.shape
    B = graph_pool.shape[0]
    P = params["w1"].shape[-1]              # padded feature width (128)
    Op = params["wp"].shape[-1]             # padded output width (128)
    Np = _round_up(N, LANE)                 # lane-dense node axis
    Bp = _round_up(B, SUBLANE)

    x_p = jnp.zeros((Np, P), jnp.bfloat16).at[:N, :din].set(x.astype(jnp.bfloat16))
    adj_p = jnp.zeros((Np, Np), jnp.bfloat16).at[:N, :N].set(adj.astype(jnp.bfloat16))
    # graph_pool values are 1/nodes_per_graph (power of two here) -> exact in bf16;
    # either way the f32 accumulation keeps rounding negligible.
    pool_p = jnp.zeros((Bp, Np), jnp.bfloat16).at[:B, :N].set(
        graph_pool.astype(jnp.bfloat16))

    args = (params["eps"], adj_p, pool_p, x_p,
            params["w1"], params["b1"], params["w2"], params["b2"],
            params["wp"], params["bp"])

    num_gin = params["w1"].shape[0]
    num_layers = num_gin + 1
    flops = (num_gin * (2 * Np * Np * P + 2 * 2 * Np * P * P)        # adj@h + 2 MLP linears
             + num_layers * 2 * Bp * Np * P                          # per-layer pool@h
             + 2 * Bp * (num_layers * P) * Op)                       # fused prediction head
    bytes_accessed = (sum(int(a.size) * a.dtype.itemsize for a in args)
                      + Bp * Op * 4)

    vspec = pl.BlockSpec(memory_space=pltpu.MemorySpace.VMEM)
    sspec = pl.BlockSpec(memory_space=pltpu.MemorySpace.SMEM)

    score_p = pl.pallas_call(
        graphcnn_fused_kernel,
        out_shape=jax.ShapeDtypeStruct((Bp, Op), jnp.float32),
        in_specs=[sspec] + [vspec] * 9,
        out_specs=vspec,
        cost_estimate=pl.CostEstimate(flops=int(flops), transcendentals=0,
                                      bytes_accessed=int(bytes_accessed)),
    )(*args)
    return score_p[:B, :output_dim]


# ----------------------------------------------------------------------------
# Deterministic parameter / input construction
# ----------------------------------------------------------------------------
def fold_bn(gamma, beta, running_mean, running_var, eps=1e-5):
    """Eval-mode BatchNorm1d as a per-feature affine (scale, bias)."""
    scale = gamma / jnp.sqrt(running_var + eps)
    bias = beta - running_mean * scale
    return scale, bias


def build_params(key, num_layers, num_mlp_layers, input_dim, hidden_dim, output_dim):
    assert num_mlp_layers == 2  # kernel implements the 2-layer MLP of this config
    P = _round_up(max(input_dim, hidden_dim), LANE)
    Op = _round_up(output_dim, LANE)

    keys = jax.random.split(key, 2 * (num_layers - 1) + num_layers)
    ki = iter(range(len(keys)))

    def lin(k, din, dout):
        # torch Linear stores W:[out,in]; we use W^T:[in,out] and bias:[out]
        w = jax.random.normal(k, (din, dout), jnp.float32) * 0.1
        b = jnp.zeros((dout,), jnp.float32)
        return w, b

    def pad_mat(w, rows, cols):
        return jnp.zeros((rows, cols), jnp.float32).at[:w.shape[0], :w.shape[1]].set(w)

    def pad_bias(b, cols):
        return jnp.zeros((1, cols), jnp.float32).at[0, :b.shape[0]].set(b)

    ones = jnp.ones((hidden_dim,), jnp.float32)
    zeros = jnp.zeros((hidden_dim,), jnp.float32)

    w1s, b1s, w2s, b2s = [], [], [], []
    for layer in range(num_layers - 1):
        din = input_dim if layer == 0 else hidden_dim
        w1, b1 = lin(keys[next(ki)], din, hidden_dim)
        w2, b2 = lin(keys[next(ki)], hidden_dim, hidden_dim)
        # BatchNorm1d default init (gamma=1, beta=0, mean=0, var=1), eval mode,
        # folded into the preceding Linear at build time.
        s1, t1 = fold_bn(ones, zeros, zeros, ones)   # MLP-internal BN
        so, to = fold_bn(ones, zeros, zeros, ones)   # GraphCNN.batch_norms[layer]
        w1_eff, b1_eff = w1 * s1[None, :], b1 * s1 + t1
        w2_eff, b2_eff = w2 * so[None, :], b2 * so + to
        w1s.append(pad_mat(w1_eff, P, P)); b1s.append(pad_bias(b1_eff, P))
        w2s.append(pad_mat(w2_eff, P, P)); b2s.append(pad_bias(b2_eff, P))

    # Prediction head: pre-stack the per-layer Linear weights along the input
    # axis ([L*P, Op]) and pre-sum the biases, so the kernel does one dot.
    wps, bp_sum = [], jnp.zeros((1, Op), jnp.float32)
    for layer in range(num_layers):
        din = input_dim if layer == 0 else hidden_dim
        wp, bp = lin(keys[next(ki)], din, output_dim)
        wps.append(pad_mat(wp, P, Op))
        bp_sum = bp_sum + pad_bias(bp, Op)

    return {
        "eps": jnp.zeros((num_layers - 1,), jnp.float32),  # nn.Parameter(zeros)
        "w1": jnp.stack(w1s).astype(jnp.bfloat16),
        "b1": jnp.stack(b1s),
        "w2": jnp.stack(w2s).astype(jnp.bfloat16),
        "b2": jnp.stack(b2s),
        "wp": jnp.concatenate(wps, axis=0).astype(jnp.bfloat16),   # [L*P, Op]
        "bp": bp_sum,                                              # [1, Op]
    }


def build_graph_batch(num_graphs, nodes_per_graph):
    """Two deterministic ring graphs -> block-diagonal dense adjacency (no self
    loops, matching learn_eps=True) and an 'average' graph_pool matrix."""
    N = num_graphs * nodes_per_graph
    adj = jnp.zeros((N, N), jnp.float32)
    for g in range(num_graphs):
        off = g * nodes_per_graph
        for j in range(nodes_per_graph):
            a = off + j
            b = off + (j + 1) % nodes_per_graph
            adj = adj.at[a, b].set(1.0)
            adj = adj.at[b, a].set(1.0)
    pool = jnp.zeros((num_graphs, N), jnp.float32)
    for g in range(num_graphs):
        off = g * nodes_per_graph
        pool = pool.at[g, off:off + nodes_per_graph].set(1.0 / nodes_per_graph)
    return adj, pool


# ----------------------------------------------------------------------------
if __name__ == "__main__":
    num_graphs = 2
    nodes_per_graph = 8
    N = num_graphs * nodes_per_graph          # 16 total nodes
    input_dim, hidden_dim, output_dim = 8, 32, 4
    num_layers, num_mlp_layers = 3, 2

    key = jax.random.PRNGKey(0)
    k_x, k_p = jax.random.split(key)
    x = jax.random.normal(k_x, (N, input_dim), jnp.float32)   # X_concat
    adj, graph_pool = build_graph_batch(num_graphs, nodes_per_graph)
    params = build_params(k_p, num_layers, num_mlp_layers,
                          input_dim, hidden_dim, output_dim)

    fwd = jax.jit(functools.partial(graphcnn_forward, output_dim=output_dim))
    score = fwd(x, adj, graph_pool, params)
    jax.block_until_ready(score)
    assert score.shape == (num_graphs, output_dim)
    assert bool(jnp.all(jnp.isfinite(score)))
    print("KERNEL_OK")
</pallas_src>

<mosaic_0001>
module attributes {stable_mosaic.version = 11 : i64} {
  func.func @graphcnn_fused_kernel(%arg0: memref<2xf32, #tpu.memory_space<smem>>, %arg1: memref<128x128xbf16, #tpu.memory_space<vmem>>, %arg2: memref<8x128xbf16, #tpu.memory_space<vmem>>, %arg3: memref<128x128xbf16, #tpu.memory_space<vmem>>, %arg4: memref<2x128x128xbf16, #tpu.memory_space<vmem>>, %arg5: memref<2x1x128xf32, #tpu.memory_space<vmem>>, %arg6: memref<2x128x128xbf16, #tpu.memory_space<vmem>>, %arg7: memref<2x1x128xf32, #tpu.memory_space<vmem>>, %arg8: memref<384x128xbf16, #tpu.memory_space<vmem>>, %arg9: memref<1x128xf32, #tpu.memory_space<vmem>>, %arg10: memref<8x128xf32, #tpu.memory_space<vmem>>) attributes {dimension_semantics = [], scalar_prefetch = 0 : i64, scratch_operands = 0 : i64, tpu.core_type = #tpu.core_type<tc>} {
    %c0 = arith.constant 0 : index
    %c0_0 = arith.constant 0 : index
    %0 = vector.load %arg1[%c0, %c0_0] : memref<128x128xbf16, #tpu.memory_space<vmem>>, vector<128x128xbf16>
    %c0_1 = arith.constant 0 : index
    %c0_2 = arith.constant 0 : index
    %1 = vector.load %arg2[%c0_1, %c0_2] : memref<8x128xbf16, #tpu.memory_space<vmem>>, vector<8x128xbf16>
    %c0_3 = arith.constant 0 : index
    %c0_4 = arith.constant 0 : index
    %2 = vector.load %arg3[%c0_3, %c0_4] : memref<128x128xbf16, #tpu.memory_space<vmem>>, vector<128x128xbf16>
    %cst = arith.constant dense<0.000000e+00> : vector<8x128xf32>
    %3 = tpu.matmul %1, %2, %cst {dimension_numbers = #tpu.dot_dimension_numbers<[1], [0], [0], [1], [0, 0, 1, 1], [], []>} : vector<8x128xbf16>, vector<128x128xbf16>, vector<8x128xf32> -> vector<8x128xf32>
    %cst_5 = arith.constant dense<0.000000e+00> : vector<128x128xf32>
    %4 = tpu.matmul %0, %2, %cst_5 {dimension_numbers = #tpu.dot_dimension_numbers<[1], [0], [0], [1], [0, 0, 1, 1], [], []>} : vector<128x128xbf16>, vector<128x128xbf16>, vector<128x128xf32> -> vector<128x128xf32>
    %c0_6 = arith.constant 0 : index
    %5 = memref.load %arg0[%c0_6] : memref<2xf32, #tpu.memory_space<smem>>
    %cst_7 = arith.constant 1.000000e+00 : f32
    %6 = arith.addf %cst_7, %5 : f32
    %7 = arith.extf %2 : vector<128x128xbf16> to vector<128x128xf32>
    %8 = vector.broadcast %6 : f32 to vector<128x128xf32>
    %9 = arith.mulf %8, %7 : vector<128x128xf32>
    %10 = arith.addf %4, %9 : vector<128x128xf32>
    %11 = arith.truncf %10 : vector<128x128xf32> to vector<128x128xbf16>
    %c0_8 = arith.constant 0 : index
    %c0_9 = arith.constant 0 : index
    %c0_10 = arith.constant 0 : index
    %12 = vector.load %arg4[%c0_8, %c0_9, %c0_10] : memref<2x128x128xbf16, #tpu.memory_space<vmem>>, vector<1x128x128xbf16>
    %13 = vector.shape_cast %12 : vector<1x128x128xbf16> to vector<128x128xbf16>
    %cst_11 = arith.constant dense<0.000000e+00> : vector<128x128xf32>
    %14 = tpu.matmul %11, %13, %cst_11 {dimension_numbers = #tpu.dot_dimension_numbers<[1], [0], [0], [1], [0, 0, 1, 1], [], []>} : vector<128x128xbf16>, vector<128x128xbf16>, vector<128x128xf32> -> vector<128x128xf32>
    %c0_12 = arith.constant 0 : index
    %c0_13 = arith.constant 0 : index
    %c0_14 = arith.constant 0 : index
    %15 = vector.load %arg5[%c0_12, %c0_13, %c0_14] : memref<2x1x128xf32, #tpu.memory_space<vmem>>, vector<1x1x128xf32>
    %16 = vector.shape_cast %15 : vector<1x1x128xf32> to vector<1x128xf32>
    %17 = vector.broadcast %16 : vector<1x128xf32> to vector<128x128xf32>
    %18 = arith.addf %14, %17 : vector<128x128xf32>
    %cst_15 = arith.constant 0.000000e+00 : f32
    %19 = vector.broadcast %cst_15 : f32 to vector<128x128xf32>
    %20 = arith.maximumf %18, %19 : vector<128x128xf32>
    %21 = arith.truncf %20 : vector<128x128xf32> to vector<128x128xbf16>
    %c0_16 = arith.constant 0 : index
    %c0_17 = arith.constant 0 : index
    %c0_18 = arith.constant 0 : index
    %22 = vector.load %arg6[%c0_16, %c0_17, %c0_18] : memref<2x128x128xbf16, #tpu.memory_space<vmem>>, vector<1x128x128xbf16>
    %23 = vector.shape_cast %22 : vector<1x128x128xbf16> to vector<128x128xbf16>
    %cst_19 = arith.constant dense<0.000000e+00> : vector<128x128xf32>
    %24 = tpu.matmul %21, %23, %cst_19 {dimension_numbers = #tpu.dot_dimension_numbers<[1], [0], [0], [1], [0, 0, 1, 1], [], []>} : vector<128x128xbf16>, vector<128x128xbf16>, vector<128x128xf32> -> vector<128x128xf32>
    %c0_20 = arith.constant 0 : index
    %c0_21 = arith.constant 0 : index
    %c0_22 = arith.constant 0 : index
    %25 = vector.load %arg7[%c0_20, %c0_21, %c0_22] : memref<2x1x128xf32, #tpu.memory_space<vmem>>, vector<1x1x128xf32>
    %26 = vector.shape_cast %25 : vector<1x1x128xf32> to vector<1x128xf32>
    %27 = vector.broadcast %26 : vector<1x128xf32> to vector<128x128xf32>
    %28 = arith.addf %24, %27 : vector<128x128xf32>
    %cst_23 = arith.constant 0.000000e+00 : f32
    %29 = vector.broadcast %cst_23 : f32 to vector<128x128xf32>
    %30 = arith.maximumf %28, %29 : vector<128x128xf32>
    %31 = arith.truncf %30 : vector<128x128xf32> to vector<128x128xbf16>
    %cst_24 = arith.constant dense<0.000000e+00> : vector<8x128xf32>
    %32 = tpu.matmul %1, %31, %cst_24 {dimension_numbers = #tpu.dot_dimension_numbers<[1], [0], [0], [1], [0, 0, 1, 1], [], []>} : vector<8x128xbf16>, vector<128x128xbf16>, vector<8x128xf32> -> vector<8x128xf32>
    %cst_25 = arith.constant dense<0.000000e+00> : vector<128x128xf32>
    %33 = tpu.matmul %0, %31, %cst_25 {dimension_numbers = #tpu.dot_dimension_numbers<[1], [0], [0], [1], [0, 0, 1, 1], [], []>} : vector<128x128xbf16>, vector<128x128xbf16>, vector<128x128xf32> -> vector<128x128xf32>
    %c1 = arith.constant 1 : index
    %34 = memref.load %arg0[%c1] : memref<2xf32, #tpu.memory_space<smem>>
    %cst_26 = arith.constant 1.000000e+00 : f32
    %35 = arith.addf %cst_26, %34 : f32
    %36 = arith.extf %31 : vector<128x128xbf16> to vector<128x128xf32>
    %37 = vector.broadcast %35 : f32 to vector<128x128xf32>
    %38 = arith.mulf %37, %36 : vector<128x128xf32>
    %39 = arith.addf %33, %38 : vector<128x128xf32>
    %40 = arith.truncf %39 : vector<128x128xf32> to vector<128x128xbf16>
    %c1_27 = arith.constant 1 : index
    %c0_28 = arith.constant 0 : index
    %c0_29 = arith.constant 0 : index
    %41 = vector.load %arg4[%c1_27, %c0_28, %c0_29] : memref<2x128x128xbf16, #tpu.memory_space<vmem>>, vector<1x128x128xbf16>
    %42 = vector.shape_cast %41 : vector<1x128x128xbf16> to vector<128x128xbf16>
    %cst_30 = arith.constant dense<0.000000e+00> : vector<128x128xf32>
    %43 = tpu.matmul %40, %42, %cst_30 {dimension_numbers = #tpu.dot_dimension_numbers<[1], [0], [0], [1], [0, 0, 1, 1], [], []>} : vector<128x128xbf16>, vector<128x128xbf16>, vector<128x128xf32> -> vector<128x128xf32>
    %c1_31 = arith.constant 1 : index
    %c0_32 = arith.constant 0 : index
    %c0_33 = arith.constant 0 : index
    %44 = vector.load %arg5[%c1_31, %c0_32, %c0_33] : memref<2x1x128xf32, #tpu.memory_space<vmem>>, vector<1x1x128xf32>
    %45 = vector.shape_cast %44 : vector<1x1x128xf32> to vector<1x128xf32>
    %46 = vector.broadcast %45 : vector<1x128xf32> to vector<128x128xf32>
    %47 = arith.addf %43, %46 : vector<128x128xf32>
    %cst_34 = arith.constant 0.000000e+00 : f32
    %48 = vector.broadcast %cst_34 : f32 to vector<128x128xf32>
    %49 = arith.maximumf %47, %48 : vector<128x128xf32>
    %50 = arith.truncf %49 : vector<128x128xf32> to vector<128x128xbf16>
    %c1_35 = arith.constant 1 : index
    %c0_36 = arith.constant 0 : index
    %c0_37 = arith.constant 0 : index
    %51 = vector.load %arg6[%c1_35, %c0_36, %c0_37] : memref<2x128x128xbf16, #tpu.memory_space<vmem>>, vector<1x128x128xbf16>
    %52 = vector.shape_cast %51 : vector<1x128x128xbf16> to vector<128x128xbf16>
    %cst_38 = arith.constant dense<0.000000e+00> : vector<128x128xf32>
    %53 = tpu.matmul %50, %52, %cst_38 {dimension_numbers = #tpu.dot_dimension_numbers<[1], [0], [0], [1], [0, 0, 1, 1], [], []>} : vector<128x128xbf16>, vector<128x128xbf16>, vector<128x128xf32> -> vector<128x128xf32>
    %c1_39 = arith.constant 1 : index
    %c0_40 = arith.constant 0 : index
    %c0_41 = arith.constant 0 : index
    %54 = vector.load %arg7[%c1_39, %c0_40, %c0_41] : memref<2x1x128xf32, #tpu.memory_space<vmem>>, vector<1x1x128xf32>
    %55 = vector.shape_cast %54 : vector<1x1x128xf32> to vector<1x128xf32>
    %56 = vector.broadcast %55 : vector<1x128xf32> to vector<128x128xf32>
    %57 = arith.addf %53, %56 : vector<128x128xf32>
    %cst_42 = arith.constant 0.000000e+00 : f32
    %58 = vector.broadcast %cst_42 : f32 to vector<128x128xf32>
    %59 = arith.maximumf %57, %58 : vector<128x128xf32>
    %60 = arith.truncf %59 : vector<128x128xf32> to vector<128x128xbf16>
    %cst_43 = arith.constant dense<0.000000e+00> : vector<8x128xf32>
    %61 = tpu.matmul %1, %60, %cst_43 {dimension_numbers = #tpu.dot_dimension_numbers<[1], [0], [0], [1], [0, 0, 1, 1], [], []>} : vector<8x128xbf16>, vector<128x128xbf16>, vector<8x128xf32> -> vector<8x128xf32>
    %62 = tpu.concatenate %3, %32, %61 in 1 : vector<8x128xf32>, vector<8x128xf32>, vector<8x128xf32> -> vector<8x384xf32>
    %63 = arith.truncf %62 : vector<8x384xf32> to vector<8x384xbf16>
    %c0_44 = arith.constant 0 : index
    %c0_45 = arith.constant 0 : index
    %64 = vector.load %arg8[%c0_44, %c0_45] : memref<384x128xbf16, #tpu.memory_space<vmem>>, vector<384x128xbf16>
    %cst_46 = arith.constant dense<0.000000e+00> : vector<8x128xf32>
    %65 = tpu.matmul %63, %64, %cst_46 {dimension_numbers = #tpu.dot_dimension_numbers<[1], [0], [0], [1], [0, 0, 1, 1], [], []>} : vector<8x384xbf16>, vector<384x128xbf16>, vector<8x128xf32> -> vector<8x128xf32>
    %c0_47 = arith.constant 0 : index
    %c0_48 = arith.constant 0 : index
    %66 = vector.load %arg9[%c0_47, %c0_48] : memref<1x128xf32, #tpu.memory_space<vmem>>, vector<1x128xf32>
    %67 = vector.broadcast %66 : vector<1x128xf32> to vector<8x128xf32>
    %68 = arith.addf %65, %67 : vector<8x128xf32>
    %c0_49 = arith.constant 0 : index
    %c0_50 = arith.constant 0 : index
    %69 = vector.load %arg10[%c0_49, %c0_50] : memref<8x128xf32, #tpu.memory_space<vmem>>, vector<8x128xf32>
    tpu.vector_store %arg10[%c0_49, %c0_50], %68 {strides = array<i32>} : memref<8x128xf32, #tpu.memory_space<vmem>>, vector<8x128xf32>,
    return
  }
}

</mosaic_0001>

<bundles_post_ra>
// kernel: graphcnn_forward.1
= control target key start
LH: loop header
LB: loop body
LE: loop exit
PB: predicated region body
PF: predicated region fallthrough
CT: control target
= control target key end

     0   :  { %15 = vsyncpa [#allocation4], 0  ;;  %s2797_s0 = inlined_call_operand.vmem [shape: f32[2], index: 0, kind: input, shape index: {}]   ;;  %s2798_s1 = inlined_call_operand.vmem [shape: bf16[128,128], index: 1, kind: input, shape index: {}]   ;;  %s2799_s2 = inlined_call_operand.vmem [shape: bf16[8,128], index: 2, kind: input, shape index: {}]   ;;  %s2800_s3 = inlined_call_operand.vmem [shape: bf16[128,128], index: 3, kind: input, shape index: {}]   ;;  %s2801_s4 = inlined_call_operand.hbm [shape: bf16[2,128,128], index: 4, kind: input, shape index: {}]   ;;  %s2802_s5 = inlined_call_operand.vmem [shape: f32[2,1,128], index: 5, kind: input, shape index: {}]   ;;  %s2803_s6 = inlined_call_operand.hbm [shape: bf16[2,128,128], index: 6, kind: input, shape index: {}]   ;;  %s2804_s7 = inlined_call_operand.vmem [shape: f32[2,1,128], index: 7, kind: input, shape index: {}]   ;;  %s2805_s8 = inlined_call_operand.vmem [shape: bf16[384,128], index: 8, kind: input, shape index: {}]   ;;  %s2806_s9 = inlined_call_operand.vmem [shape: f32[1,128], index: 9, kind: input, shape index: {}]   ;;  %s2807_s10 = inlined_call_operand.vmem [shape: f32[8,128], index: 10, kind: output, shape index: {}]  }
   0x1   :  { %16 = vsyncpa [#allocation3], 0  ;;  %s24_s15 = sshll.u32 %s2797_s0, 4  ;;  %s25_s15 = int_to_ptr.vmem [resolvable:$true] %s24_s15 }
   0x2   :  { %17 = vsyncpa [#allocation7], 0  ;;  %s2262_s16 = scalar_lea.vmem %s25_s15, 16  ;;  %p2267_p1 = scmp.lt.s32.totalorder %s25_s15, %s25_s15 }
   0x3   :  { %p2263_p0 = scmp.ne.s32.totalorder %s25_s15, %s2262_s16  ;;  %p2268_p2 = scmp.lt.s32.totalorder %s2262_s16, %s2262_s16 }
   0x5   :  { %p2269_p3 = por %p2268_p2, %p2267_p1 }
   0x7   :  { %p2270_p4 = pnand %p2269_p3, %p2263_p0 }
   0x9   :  { %2273 = shalt.err (!%p2270_p4)
}
   0xa   :  { %s2320_s17 = smov [#allocation2]   ;;  %s2321_s18 = smov [#allocation5]  }
   0xb   :  { %27 = dma.vmem_to_smem %s25_s15, 16, %s2320_s17, [#allocation4]  }
   0xc   :  { %s39_s19 = sshll.u32 %s2321_s18, 4  ;;  %s40_s19 = int_to_ptr.vmem [resolvable:$true] %s39_s19 }
   0xd   :  { %s2282_s20 = scalar_lea.vmem %s40_s19, 2048  ;;  %p2287_p6 = scmp.lt.s32.totalorder %s40_s19, %s40_s19 }
   0xe   :  { %p2283_p5 = scmp.ne.s32.totalorder %s40_s19, %s2282_s20  ;;  %p2288_p7 = scmp.lt.s32.totalorder %s2282_s20, %s2282_s20 }
  0x10   :  { %p2289_p8 = por %p2288_p7, %p2287_p6 }
  0x12   :  { %p2290_p9 = pnand %p2289_p8, %p2283_p5 }
  0x14   :  { %2293 = shalt.err (!%p2290_p9)
}
  0x15   :  { %s2322_s0 = smov 64   ;;  %s2323_s21 = smov 4  }
  0x16   :  { %45 = dma.hbm_to_vmem [thread:$0]  %s2801_s4, 2048, %s40_s19, [#allocation3], %s2322_s0, %s2322_s0, %s2323_s21  }
  0x17   :  { %s2324_s24 = smov [#allocation6]  }
  0x18   :  { %s53_s25 = sshll.u32 %s2324_s24, 4  ;;  %s54_s25 = int_to_ptr.vmem [resolvable:$true] %s53_s25 }
  0x19   :  { %s2302_s26 = scalar_lea.vmem %s54_s25, 2048  ;;  %p2307_p11 = scmp.lt.s32.totalorder %s54_s25, %s54_s25 }
  0x1a   :  { %p2303_p10 = scmp.ne.s32.totalorder %s54_s25, %s2302_s26  ;;  %p2308_p12 = scmp.lt.s32.totalorder %s2302_s26, %s2302_s26 }
  0x1c   :  { %p2309_p13 = por %p2308_p12, %p2307_p11 }
  0x1e   :  { %p2310_p0 = pnand %p2309_p13, %p2303_p10 }
  0x20   :  { %2313 = shalt.err (!%p2310_p0)
}
  0x21   :  { %59 = dma.hbm_to_vmem [thread:$0]  %s2803_s6, 2048, %s54_s25, [#allocation7], %s2322_s0, %s2322_s0, %s2323_s21  }
  0x22   :  { %2314 = dma.done.wait [#allocation4], 16  }
  0x23   :  { %2315 = vsyncadd [#allocation4], 4294967280 }
  0x24   :  { %2316 = dma.done.wait [#allocation3], 2048  }
  0x25   :  { %2317 = vsyncadd [#allocation3], 4294965248 }
  0x26   :  { %2318 = dma.done.wait [#allocation7], 2048  }
  0x27   :  { %2319 = vsyncadd [#allocation7], 4294965248 }
  0x28   :  { %75 = sfence }
  0x29   :  { %v2394_v0 = vld [vmem:[%s2800_s3 + $0x38] sm:$0xff]   ;;  %v2399_v1 = vld [vmem:[%s2800_s3 + $0x30] sm:$0xff]   ;;  %v2325_v2 = vmov 0.0   ;;  %vm2326_vm0 = vmmov 0   ;;  %v2407_v3 = vld [vmem:[%s2800_s3 + $0x28] sm:$0xff]   ;;  %s1702_s21 = sld [smem:[#allocation2 + $0x1]] }
  0x2a   :  { %1902 = vmatprep.subr.bf16.mxu0 %v2325_v2  ;;  %1918 = vmatprep.mubr.msk.bf16.mxu0 %vm2326_vm0, %v2325_v2  ;;  %v2413_v4 = vld [vmem:[%s2798_s1] sm:$0xff]   ;;  %v2432_v6 = vld [vmem:[%s2800_s3 + $0x18] sm:$0xff]   ;;  %v2441_v7 = vld [vmem:[%s2800_s3 + $0x10] sm:$0xff]  }
  0x2b   :  { %1922 = vmatprep.subr.bf16.mxu1 %v2394_v0  ;;  %1903 = vmatpush3.bf16.msra.mxu0 %v2394_v0  ;;  %v2423_v5 = vld [vmem:[%s2800_s3 + $0x20] sm:$0xff]   ;;  %v2448_v8 = vld [vmem:[%s2800_s3 + $0x8] sm:$0xff]   ;;  %v2197_v10 = vld [vmem:[#allocation5 + $0x38] sm:$0xff]   ;;  %v207_v49 = vunpack.c.h.bf16 %v2432_v6  ;;  %v204_v52 = vunpack.c.l.bf16 %v2441_v7  ;;  %v205_v53 = vunpack.c.h.bf16 %v2441_v7  ;;  %v206_v55 = vunpack.c.l.bf16 %v2432_v6 }
  0x2c   :  { %1923 = vmatpush3.bf16.msra.mxu1 %v2394_v0  ;;  %1904 = vmatprep.subr.bf16.mxu0 %v2325_v2  ;;  %v2457_v9 = vld [vmem:[%s2800_s3] sm:$0xff]   ;;  %v2472_v11 = vld [vmem:[%s2798_s1 + $0x8] sm:$0xff]   ;;  %v2482_v13 = vld [vmem:[%s2798_s1 + $0x10] sm:$0xff]   ;;  %v203_v31 = vunpack.c.h.bf16 %v2448_v8  ;;  %v202_v35 = vunpack.c.l.bf16 %v2448_v8 }
  0x2d   :  { %1924 = vmatprep.subr.bf16.mxu1 %v2399_v1  ;;  %1938 = vmatprep.mubr.bf16.mxu1 %v2413_v4  ;;  %v2477_v12 = vld [vmem:[%s2799_s2] sm:$0xf]  ;;  %v2198_v14 = vld [vmem:[#allocation5 + $0x30] sm:$0xff]   ;;  %v2199_v15 = vld [vmem:[#allocation5 + $0x28] sm:$0xff]   ;;  %v200_v32 = vunpack.c.l.bf16 %v2457_v9  ;;  %v201_v33 = vunpack.c.h.bf16 %v2457_v9 }
  0x2e   :  { %v2492_v16 = vld [vmem:[%s2798_s1 + $0x18] sm:$0xff]   ;;  %v2497_v17 = vld [vmem:[%s2798_s1 + $0x20] sm:$0xff]   ;;  %v2504_v20 = vld [vmem:[%s2798_s1 + $0x28] sm:$0xff]  }
  0x2f   :  { %1905 = vmatpush3.bf16.msra.mxu0 %v2399_v1  ;;  %v2200_v18 = vld [vmem:[#allocation5 + $0x20] sm:$0xff]   ;;  %v2201_v19 = vld [vmem:[#allocation5 + $0x18] sm:$0xff]   ;;  %v2509_v21 = vld [vmem:[%s2798_s1 + $0x30] sm:$0xff]   ;;  %s811_s22 = sadd.f32 1.0, %s1702_s21 }
  0x30   :  { %1925 = vmatpush3.bf16.msra.mxu1 %v2399_v1  ;;  %1906 = vmatprep.subr.bf16.mxu0 %v2325_v2  ;;  %v2516_v22 = vld [vmem:[%s2798_s1 + $0x38] sm:$0xff]   ;;  %v2202_v23 = vld [vmem:[#allocation5 + $0x10] sm:$0xff]   ;;  %v2203_v24 = vld [vmem:[#allocation5 + $0x8] sm:$0xff]   ;;  %s198_s1 = sld [smem:[#allocation2]] }
  0x31   :  { %1926 = vmatprep.subr.bf16.mxu1 %v2407_v3  ;;  %v2204_v25 = vld [vmem:[#allocation5] sm:$0xff]   ;;  %v2205_v26 = vld [vmem:[#allocation6 + $0x38] sm:$0xff]   ;;  %v2206_v27 = vld [vmem:[#allocation6 + $0x30] sm:$0xff]  }
  0x32   :  { %v2207_v28 = vld [vmem:[#allocation6 + $0x28] sm:$0xff]   ;;  %v2208_v29 = vld [vmem:[#allocation6 + $0x20] sm:$0xff]   ;;  %v2209_v30 = vld [vmem:[#allocation6 + $0x18] sm:$0xff]  }
  0x33   :  { %1907 = vmatpush3.bf16.msra.mxu0 %v2407_v3 }
  0x34   :  { %1927 = vmatpush3.bf16.msra.mxu1 %v2407_v3  ;;  %1908 = vmatprep.subr.bf16.mxu0 %v2325_v2 }
  0x35   :  { %1928 = vmatprep.subr.bf16.mxu1 %v2423_v5 }
  0x36   :  { %s199_s17 = sadd.f32 1.0, %s198_s1 }
  0x37   :  { %1909 = vmatpush3.bf16.msra.mxu0 %v2423_v5 }
  0x38   :  { %1929 = vmatpush3.bf16.msra.mxu1 %v2423_v5  ;;  %1910 = vmatprep.subr.bf16.mxu0 %v2325_v2  ;;  %v2526_v37 = vstv %s199_s17 }
  0x39   :  { %1930 = vmatprep.subr.bf16.mxu1 %v2432_v6  ;;  %v220_v40 = vmul.f32 %v2526_v37, %v203_v31  ;;  %v217_v41 = vmul.f32 %v2526_v37, %v200_v32  ;;  %v218_v42 = vmul.f32 %v2526_v37, %v201_v33  ;;  %v219_v44 = vmul.f32 %v2526_v37, %v202_v35 }
  0x3a   :  { %v224_v60 = vmul.f32 %v2526_v37, %v207_v49  ;;  %v221_v61 = vmul.f32 %v2526_v37, %v204_v52  ;;  %v222_v62 = vmul.f32 %v2526_v37, %v205_v53  ;;  %v223_v63 = vmul.f32 %v2526_v37, %v206_v55 }
  0x3b   :  { %1911 = vmatpush3.bf16.msra.mxu0 %v2432_v6  ;;  %v215_v35 = vunpack.c.h.bf16 %v2394_v0 }
  0x3c   :  { %1931 = vmatpush3.bf16.msra.mxu1 %v2432_v6  ;;  %1912 = vmatprep.subr.bf16.mxu0 %v2325_v2 }
  0x3d   :  { %1932 = vmatprep.subr.bf16.mxu1 %v2441_v7 }
  0x3f   :  { %1913 = vmatpush3.bf16.msra.mxu0 %v2441_v7 }
  0x40   :  { %1933 = vmatpush3.bf16.msra.mxu1 %v2441_v7  ;;  %1914 = vmatprep.subr.bf16.mxu0 %v2325_v2 }
  0x41   :  { %1934 = vmatprep.subr.bf16.mxu1 %v2448_v8 }
  0x43   :  { %1915 = vmatpush3.bf16.msra.mxu0 %v2448_v8 }
  0x44   :  { %1935 = vmatpush3.bf16.msra.mxu1 %v2448_v8  ;;  %1916 = vmatprep.subr.bf16.mxu0 %v2325_v2 }
  0x45   :  { %1936 = vmatprep.subr.bf16.mxu1 %v2457_v9 }
  0x47   :  { %1917 = vmatpush3.bf16.msra.mxu0 %v2457_v9 }
  0x48   :  { %1937 = vmatpush3.bf16.msra.mxu1 %v2457_v9  ;;  %1954 = vmatprep.subr.bf16.mxu0 %v2197_v10 }
  0x49   :  { %1986 = vmatprep.subr.bf16.mxu1 %v2205_v26 }
  0x4a   :  { %1919 = vmatmul.mubr.bf16.vlgmr.msra.gmra.mxu0 %v2477_v12 }
  0x4b   :  { %1939 = vmatmul.mubr.bf16.vlgmr.msra.gmra.mxu1 %v2472_v11  ;;  %1955 = vmatpush3.bf16.msra.mxu0 %v2197_v10  ;;  %v211_v10 = vunpack.c.h.bf16 %v2407_v3 }
  0x4c   :  { %1942 = vmatprep.mubr.bf16.mxu1 %v2482_v13  ;;  %1956 = vmatprep.subr.bf16.mxu0 %v2198_v14 }
  0x4d   :  { %1987 = vmatpush3.bf16.msra.mxu1 %v2205_v26 }
  0x4e   :  { %1988 = vmatprep.subr.bf16.mxu1 %v2206_v27 }
  0x4f   :  { %1957 = vmatpush3.bf16.msra.mxu0 %v2198_v14 }
  0x50   :  { %1958 = vmatprep.subr.bf16.mxu0 %v2199_v15 }
  0x51   :  { %1989 = vmatpush3.bf16.msra.mxu1 %v2206_v27 }
  0x52   :  { %1990 = vmatprep.subr.bf16.mxu1 %v2207_v28 }
  0x53   :  { %1943 = vmatmul.mubr.bf16.gmra.mxu1 %v2492_v16  ;;  %1959 = vmatpush3.bf16.msra.mxu0 %v2199_v15  ;;  %v208_v15 = vunpack.c.l.bf16 %v2423_v5 }
  0x54   :  { %1946 = vmatprep.mubr.bf16.mxu1 %v2497_v17  ;;  %1960 = vmatprep.subr.bf16.mxu0 %v2200_v18 }
  0x55   :  { %1991 = vmatpush3.bf16.msra.mxu1 %v2207_v28  ;;  %v228_v28 = vmul.f32 %v2526_v37, %v211_v10 }
  0x56   :  { %1992 = vmatprep.subr.bf16.mxu1 %v2208_v29 }
  0x57   :  { %1961 = vmatpush3.bf16.msra.mxu0 %v2200_v18  ;;  %v209_v18 = vunpack.c.h.bf16 %v2423_v5 }
  0x58   :  { %1962 = vmatprep.subr.bf16.mxu0 %v2201_v19 }
  0x59   :  { %1993 = vmatpush3.bf16.msra.mxu1 %v2208_v29  ;;  %v225_v29 = vmul.f32 %v2526_v37, %v208_v15 }
  0x5a   :  { %1994 = vmatprep.subr.bf16.mxu1 %v2209_v30 }
  0x5b   :  { %1947 = vmatmul.mubr.bf16.gmra.mxu1 %v2504_v20  ;;  %1963 = vmatpush3.bf16.msra.mxu0 %v2201_v19 }
  0x5c   :  { %1950 = vmatprep.mubr.bf16.mxu1 %v2509_v21  ;;  %1964 = vmatprep.subr.bf16.mxu0 %v2202_v23 }
  0x5d   :  { %1995 = vmatpush3.bf16.msra.mxu1 %v2209_v30  ;;  %v226_v30 = vmul.f32 %v2526_v37, %v209_v18 }
  0x5f   :  { %1965 = vmatpush3.bf16.msra.mxu0 %v2202_v23  ;;  %v210_v23 = vunpack.c.l.bf16 %v2407_v3 }
  0x60   :  { %1966 = vmatprep.subr.bf16.mxu0 %v2203_v24 }
  0x61   :  { %v227_v31 = vmul.f32 %v2526_v37, %v210_v23 }
  0x63   :  { %1951 = vmatmul.mubr.bf16.gmra.mxu1 %v2516_v22  ;;  %1967 = vmatpush3.bf16.msra.mxu0 %v2203_v24 }
  0x64   :  { %1968 = vmatprep.subr.bf16.mxu0 %v2204_v25 }
  0x67   :  { %1969 = vmatpush3.bf16.msra.mxu0 %v2204_v25 }
  0x68   :  { %2018 = vmatprep.subr.bf16.mxu0 %v2325_v2 }
 0x10a   :  { %v2523_v34 = vpop.f32.mrf.mxu0 }
 0x10b   :  { %v1940_v36 = vpop.f32.mrf.mxu1 }
 0x10c   :  { %v1920_v38 = vpop.f32.mrf.mxu0  ;;  %v324_v54 = vadd.f32 %v1940_v36, %v219_v44 }
 0x10d   :  { %v315_v39 = vpop.f32.mrf.mxu1  ;;  %v212_v38 = vunpack.c.l.bf16 %v2399_v1 }
 0x10e   :  { %v195_v43 = vpop.f32.mrf.mxu0  ;;  %v316_v50 = vadd.f32 %v315_v39, %v217_v41  ;;  %v213_v39 = vunpack.c.h.bf16 %v2399_v1  ;;  %v214_v41 = vunpack.c.l.bf16 %v2394_v0 }
 0x10f   :  { %v1941_v45 = vpop.f32.mrf.mxu1 }
 0x110   :  { %v1921_v46 = vpop.f32.mrf.mxu0  ;;  %v327_v47 = vadd.f32 %v1941_v45, %v220_v40  ;;  %v231_v49 = vmul.f32 %v2526_v37, %v214_v41 }
 0x111   :  { %v318_v48 = vpop.f32.mrf.mxu1  ;;  %v232_v46 = vmul.f32 %v2526_v37, %v215_v35 }
 0x112   :  { %v319_v51 = vadd.f32 %v318_v48, %v218_v42  ;;  %v379_v58 = vpack.c.bf16 %v327_v47, %v324_v54  ;;  %v229_v47 = vmul.f32 %v2526_v37, %v212_v38  ;;  %v230_v48 = vmul.f32 %v2526_v37, %v213_v39  ;;  %v2212_v37 = vld [vmem:[#allocation6] sm:$0xff]  }
 0x113   :  { %v1944_v56 = vpop.f32.mrf.mxu1 }
 0x114   :  { %v378_v57 = vpack.c.bf16 %v319_v51, %v316_v50  ;;  %v340_v19 = vadd.f32 %v1944_v56, %v223_v63  ;;  %v2210_v56 = vld [vmem:[#allocation6 + $0x10] sm:$0xff]  }
 0x115   :  { %v331_v59 = vpop.f32.mrf.mxu1  ;;  %1996 = vmatprep.subr.bf16.mxu1 %v2210_v56 }
 0x116   :  { %1970 = vmatprep.mubr.bf16.mxu0 %v378_v57  ;;  %v332_v6 = vadd.f32 %v331_v59, %v221_v61  ;;  %1997 = vmatpush3.bf16.msra.mxu1 %v2210_v56  ;;  %v2211_v57 = vld [vmem:[#allocation6 + $0x8] sm:$0xff]  }
 0x117   :  { %v1945_v8 = vpop.f32.mrf.mxu1  ;;  %1971 = vmatmul.mubr.bf16.vlgmr.msra.gmra.mxu0 %v379_v58  ;;  %1998 = vmatprep.subr.bf16.mxu1 %v2211_v57 }
 0x118   :  { %v343_v9 = vadd.f32 %v1945_v8, %v224_v60  ;;  %v1684_v60 = vld [vmem:[%s2802_s5] ss:$0 sm:$0xff] }
 0x119   :  { %v334_v7 = vpop.f32.mrf.mxu1 }
 0x11a   :  { %v335_v14 = vadd.f32 %v334_v7, %v222_v62  ;;  %v381_v26 = vpack.c.bf16 %v343_v9, %v340_v19  ;;  %1999 = vmatpush3.bf16.msra.mxu1 %v2211_v57 }
 0x11b   :  { %v1948_v24 = vpop.f32.mrf.mxu1  ;;  %2000 = vmatprep.subr.bf16.mxu1 %v2212_v37 }
 0x11c   :  { %v380_v25 = vpack.c.bf16 %v335_v14, %v332_v6  ;;  %v356_v40 = vadd.f32 %v1948_v24, %v227_v31 }
 0x11d   :  { %v347_v27 = vpop.f32.mrf.mxu1 }
 0x11e   :  { %1974 = vmatprep.mubr.bf16.mxu0 %v380_v25  ;;  %v348_v3 = vadd.f32 %v347_v27, %v225_v29  ;;  %2001 = vmatpush3.bf16.msra.mxu1 %v2212_v37 }
 0x11f   :  { %v1949_v32 = vpop.f32.mrf.mxu1  ;;  %1975 = vmatmul.mubr.bf16.gmra.mxu0 %v381_v26 }
 0x120   :  { %v359_v33 = vadd.f32 %v1949_v32, %v228_v28 }
 0x121   :  { %v350_v5 = vpop.f32.mrf.mxu1 }
 0x122   :  { %v351_v36 = vadd.f32 %v350_v5, %v226_v30  ;;  %v383_v44 = vpack.c.bf16 %v359_v33, %v356_v40 }
 0x123   :  { %v1952_v42 = vpop.f32.mrf.mxu1 }
 0x124   :  { %v382_v43 = vpack.c.bf16 %v351_v36, %v348_v3  ;;  %v372_v0 = vadd.f32 %v1952_v42, %v231_v49 }
 0x125   :  { %v363_v45 = vpop.f32.mrf.mxu1 }
 0x126   :  { %1978 = vmatprep.mubr.bf16.mxu0 %v382_v43  ;;  %v364_v52 = vadd.f32 %v363_v45, %v229_v47 }
 0x127   :  { %v1953_v50 = vpop.f32.mrf.mxu1  ;;  %1979 = vmatmul.mubr.bf16.gmra.mxu0 %v383_v44 }
 0x128   :  { %v375_v51 = vadd.f32 %v1953_v50, %v232_v46 }
 0x129   :  { %v366_v1 = vpop.f32.mrf.mxu1 }
 0x12a   :  { %v367_v53 = vadd.f32 %v366_v1, %v230_v48  ;;  %v385_v55 = vpack.c.bf16 %v375_v51, %v372_v0 }
 0x12c   :  { %v384_v54 = vpack.c.bf16 %v367_v53, %v364_v52 }
 0x12e   :  { %1982 = vmatprep.mubr.bf16.mxu0 %v384_v54 }
 0x12f   :  { %1983 = vmatmul.mubr.bf16.gmra.mxu0 %v385_v55 }
 0x130   :  { %2034 = vmatprep.mubr.msk.bf16.mxu0 %vm2326_vm0, %v2325_v2 }
 0x1d7   :  { %v1972_v58 = vpop.f32.mrf.mxu0 }
 0x1d8   :  { %v500_v8 = vadd.f32 %v1972_v58, %v1684_v60 }
 0x1d9   :  { %v491_v59 = vpop.f32.mrf.mxu0 }
 0x1da   :  { %v492_v62 = vadd.f32 %v1684_v60, %v491_v59  ;;  %v556_v18 = vmax.f32 %v500_v8, 0.0 }
 0x1db   :  { %v1973_v61 = vpop.f32.mrf.mxu0 }
 0x1dc   :  { %v503_v63 = vadd.f32 %v1973_v61, %v1684_v60  ;;  %v554_v14 = vmax.f32 %v492_v62, 0.0 }
 0x1dd   :  { %v494_v9 = vpop.f32.mrf.mxu0 }
 0x1de   :  { %v495_v7 = vadd.f32 %v1684_v60, %v494_v9  ;;  %v557_v10 = vmax.f32 %v503_v63, 0.0 }
 0x1df   :  { %v1976_v6 = vpop.f32.mrf.mxu0 }
 0x1e0   :  { %v555_v15 = vmax.f32 %v495_v7, 0.0  ;;  %v571_v24 = vpack.c.bf16 %v557_v10, %v556_v18  ;;  %v516_v28 = vadd.f32 %v1976_v6, %v1684_v60 }
 0x1e1   :  { %v507_v19 = vpop.f32.mrf.mxu0 }
 0x1e2   :  { %v570_v23 = vpack.c.bf16 %v555_v15, %v554_v14  ;;  %v508_v26 = vadd.f32 %v1684_v60, %v507_v19  ;;  %v560_v35 = vmax.f32 %v516_v28, 0.0 }
 0x1e3   :  { %v1977_v25 = vpop.f32.mrf.mxu0 }
 0x1e4   :  { %v519_v27 = vadd.f32 %v1977_v25, %v1684_v60  ;;  %2002 = vmatprep.mubr.bf16.mxu1 %v570_v23  ;;  %v558_v33 = vmax.f32 %v508_v26, 0.0  ;;  %v1693_v25 = vld [vmem:[%s2804_s7] ss:$0 sm:$0xff] }
 0x1e5   :  { %v510_v29 = vpop.f32.mrf.mxu0  ;;  %2003 = vmatmul.mubr.bf16.vlgmr.msra.gmra.mxu1 %v571_v24 }
 0x1e6   :  { %v511_v30 = vadd.f32 %v1684_v60, %v510_v29  ;;  %v561_v31 = vmax.f32 %v519_v27, 0.0 }
 0x1e7   :  { %v1980_v32 = vpop.f32.mrf.mxu0 }
 0x1e8   :  { %v559_v5 = vmax.f32 %v511_v30, 0.0  ;;  %v573_v38 = vpack.c.bf16 %v561_v31, %v560_v35  ;;  %v532_v42 = vadd.f32 %v1980_v32, %v1684_v60 }
 0x1e9   :  { %v523_v3 = vpop.f32.mrf.mxu0 }
 0x1ea   :  { %v572_v36 = vpack.c.bf16 %v559_v5, %v558_v33  ;;  %v524_v40 = vadd.f32 %v1684_v60, %v523_v3  ;;  %v564_v49 = vmax.f32 %v532_v42, 0.0 }
 0x1eb   :  { %v1981_v39 = vpop.f32.mrf.mxu0 }
 0x1ec   :  { %v535_v41 = vadd.f32 %v1981_v39, %v1684_v60  ;;  %2006 = vmatprep.mubr.bf16.mxu1 %v572_v36  ;;  %v562_v47 = vmax.f32 %v524_v40, 0.0 }
 0x1ed   :  { %v526_v43 = vpop.f32.mrf.mxu0  ;;  %2007 = vmatmul.mubr.bf16.gmra.mxu1 %v573_v38 }
 0x1ee   :  { %v527_v44 = vadd.f32 %v1684_v60, %v526_v43  ;;  %v565_v45 = vmax.f32 %v535_v41, 0.0 }
 0x1ef   :  { %v1984_v46 = vpop.f32.mrf.mxu0 }
 0x1f0   :  { %v563_v48 = vmax.f32 %v527_v44, 0.0  ;;  %v575_v1 = vpack.c.bf16 %v565_v45, %v564_v49  ;;  %v548_v54 = vadd.f32 %v1984_v46, %v1684_v60 }
 0x1f1   :  { %v539_v50 = vpop.f32.mrf.mxu0 }
 0x1f2   :  { %v574_v51 = vpack.c.bf16 %v563_v48, %v562_v47  ;;  %v540_v53 = vadd.f32 %v1684_v60, %v539_v50  ;;  %v568_v59 = vmax.f32 %v548_v54, 0.0 }
 0x1f3   :  { %v1985_v52 = vpop.f32.mrf.mxu0 }
 0x1f4   :  { %v551_v0 = vadd.f32 %v1985_v52, %v1684_v60  ;;  %2010 = vmatprep.mubr.bf16.mxu1 %v574_v51  ;;  %v566_v37 = vmax.f32 %v540_v53, 0.0 }
 0x1f5   :  { %v542_v55 = vpop.f32.mrf.mxu0  ;;  %2011 = vmatmul.mubr.bf16.gmra.mxu1 %v575_v1 }
 0x1f6   :  { %v543_v56 = vadd.f32 %v1684_v60, %v542_v55  ;;  %v569_v57 = vmax.f32 %v551_v0, 0.0 }
 0x1f8   :  { %v567_v58 = vmax.f32 %v543_v56, 0.0  ;;  %v577_v62 = vpack.c.bf16 %v569_v57, %v568_v59 }
 0x1fa   :  { %v576_v61 = vpack.c.bf16 %v567_v58, %v566_v37 }
 0x1fc   :  { %2014 = vmatprep.mubr.bf16.mxu1 %v576_v61 }
 0x1fd   :  { %2015 = vmatmul.mubr.bf16.gmra.mxu1 %v577_v62 }
 0x1fe   :  { %2054 = vmatprep.mubr.bf16.mxu1 %v2413_v4 }
 0x2a5   :  { %v2004_v63 = vpop.f32.mrf.mxu1 }
 0x2a6   :  { %v692_v55 = vadd.f32 %v2004_v63, %v1693_v25 }
 0x2a7   :  { %v2562_v8 = vpop.f32.mrf.mxu1 }
 0x2a8   :  { %v748_v59 = vmax.f32 %v692_v55, 0.0  ;;  %v684_v61 = vadd.f32 %v1693_v25, %v2562_v8  ;;  %v2213_v8 = vld [vmem:[#allocation5 + $0x78] sm:$0xff]  }
 0x2a9   :  { %v2005_v9 = vpop.f32.mrf.mxu1 }
 0x2aa   :  { %v695_v53 = vadd.f32 %v2005_v9, %v1693_v25  ;;  %v746_v9 = vmax.f32 %v684_v61, 0.0 }
 0x2ab   :  { %v2564_v7 = vpop.f32.mrf.mxu1 }
 0x2ac   :  { %v749_v57 = vmax.f32 %v695_v53, 0.0  ;;  %v687_v37 = vadd.f32 %v1693_v25, %v2564_v7 }
 0x2ad   :  { %v2008_v10 = vpop.f32.mrf.mxu1 }
 0x2ae   :  { %v708_v47 = vadd.f32 %v2008_v10, %v1693_v25  ;;  %v2604_v62 = vpack.c.bf16 %v749_v57, %v748_v59  ;;  %v747_v63 = vmax.f32 %v687_v37, 0.0  ;;  %v2214_v10 = vld [vmem:[#allocation5 + $0x70] sm:$0xff]  }
 0x2af   :  { %v699_v6 = vpop.f32.mrf.mxu1 }
 0x2b0   :  { %v752_v1 = vmax.f32 %v708_v47, 0.0  ;;  %v700_v52 = vadd.f32 %v1693_v25, %v699_v6  ;;  %v2610_v7 = vpack.c.bf16 %v747_v63, %v746_v9  ;;  %v2215_v6 = vld [vmem:[#allocation5 + $0x68] sm:$0xff]  }
 0x2b1   :  { %v2009_v14 = vpop.f32.mrf.mxu1 }
 0x2b2   :  { %v711_v44 = vadd.f32 %v2009_v14, %v1693_v25  ;;  %v750_v56 = vmax.f32 %v700_v52, 0.0  ;;  %v2216_v14 = vld [vmem:[#allocation5 + $0x60] sm:$0xff]  }
 0x2b3   :  { %v702_v60 = vpop.f32.mrf.mxu1 }
 0x2b4   :  { %v753_v49 = vmax.f32 %v711_v44, 0.0  ;;  %v703_v50 = vadd.f32 %v1693_v25, %v702_v60  ;;  %v2217_v60 = vld [vmem:[#allocation5 + $0x58] sm:$0xff]  }
 0x2b5   :  { %v2012_v15 = vpop.f32.mrf.mxu1 }
 0x2b6   :  { %v724_v35 = vadd.f32 %v2012_v15, %v1693_v25  ;;  %v2590_v0 = vpack.c.bf16 %v753_v49, %v752_v1  ;;  %v751_v54 = vmax.f32 %v703_v50, 0.0 }
 0x2b7   :  { %v715_v18 = vpop.f32.mrf.mxu1 }
 0x2b8   :  { %v756_v42 = vmax.f32 %v724_v35, 0.0  ;;  %v716_v43 = vadd.f32 %v1693_v25, %v715_v18  ;;  %v2597_v58 = vpack.c.bf16 %v751_v54, %v750_v56  ;;  %v818_v49 = vunpack.c.l.bf16 %v2590_v0 }
 0x2b9   :  { %v2013_v19 = vpop.f32.mrf.mxu1 }
 0x2ba   :  { %v727_v31 = vadd.f32 %v2013_v19, %v1693_v25  ;;  %v754_v48 = vmax.f32 %v716_v43, 0.0  ;;  %v815_v19 = vunpack.c.h.bf16 %v2604_v62  ;;  %v819_v43 = vunpack.c.h.bf16 %v2590_v0 }
 0x2bb   :  { %v718_v23 = vpop.f32.mrf.mxu1  ;;  %v817_v47 = vunpack.c.h.bf16 %v2597_v58 }
 0x2bc   :  { %v757_v39 = vmax.f32 %v727_v31, 0.0  ;;  %v719_v40 = vadd.f32 %v1693_v25, %v718_v23  ;;  %v2630_v23 = vstv %s811_s22 }
 0x2bd   :  { %v2016_v24 = vpop.f32.mrf.mxu1  ;;  %v836_v1 = vmul.f32 %v2630_v23, %v819_v43  ;;  %v834_v54 = vmul.f32 %v2630_v23, %v817_v47  ;;  %v835_v55 = vmul.f32 %v2630_v23, %v818_v49  ;;  %v2671_v43 = vld [vmem:[%s2802_s5 + $0x1] ss:$0 sm:$0xff] }
 0x2be   :  { %v740_v26 = vadd.f32 %v2016_v24, %v1693_v25  ;;  %v2578_v45 = vpack.c.bf16 %v757_v39, %v756_v42  ;;  %v755_v46 = vmax.f32 %v719_v40, 0.0  ;;  %v812_v24 = vunpack.c.l.bf16 %v2610_v7 }
 0x2bf   :  { %v731_v4 = vpop.f32.mrf.mxu1 }
 0x2c0   :  { %v732_v28 = vadd.f32 %v1693_v25, %v731_v4  ;;  %v760_v32 = vmax.f32 %v740_v26, 0.0  ;;  %v2584_v51 = vpack.c.bf16 %v755_v46, %v754_v48  ;;  %v814_v26 = vunpack.c.l.bf16 %v2604_v62 }
 0x2c1   :  { %v2017_v27 = vpop.f32.mrf.mxu1  ;;  %v829_v31 = vmul.f32 %v2630_v23, %v812_v24  ;;  %v816_v46 = vunpack.c.l.bf16 %v2597_v58 }
 0x2c2   :  { %v743_v29 = vadd.f32 %v2017_v27, %v1693_v25  ;;  %v758_v3 = vmax.f32 %v732_v28, 0.0  ;;  %v820_v63 = vunpack.c.l.bf16 %v2584_v51  ;;  %v821_v9 = vunpack.c.h.bf16 %v2584_v51 }
 0x2c3   :  { %v734_v30 = vpop.f32.mrf.mxu1  ;;  %v833_v53 = vmul.f32 %v2630_v23, %v816_v46 }
 0x2c4   :  { %v761_v33 = vmax.f32 %v743_v29, 0.0  ;;  %v735_v5 = vadd.f32 %v1693_v25, %v734_v30  ;;  %v813_v25 = vunpack.c.h.bf16 %v2610_v7  ;;  %v832_v29 = vmul.f32 %v2630_v23, %v815_v19 }
 0x2c6   :  { %v2569_v36 = vpack.c.bf16 %v761_v33, %v760_v32  ;;  %v759_v38 = vmax.f32 %v735_v5, 0.0  ;;  %v830_v32 = vmul.f32 %v2630_v23, %v813_v25  ;;  %v831_v5 = vmul.f32 %v2630_v23, %v814_v26 }
 0x2c8   :  { %v2571_v41 = vpack.c.bf16 %v759_v38, %v758_v3  ;;  %2019 = vmatpush3.bf16.msra.mxu0 %v2569_v36  ;;  %2038 = vmatprep.subr.bf16.mxu1 %v2569_v36  ;;  %v826_v25 = vunpack.c.l.bf16 %v2569_v36 }
 0x2c9   :  { %2039 = vmatpush3.bf16.msra.mxu1 %v2569_v36  ;;  %2020 = vmatprep.subr.bf16.mxu0 %v2325_v2 }
 0x2ca   :  { %2040 = vmatprep.subr.bf16.mxu1 %v2571_v41  ;;  %v825_v19 = vunpack.c.h.bf16 %v2571_v41 }
 0x2cc   :  { %2021 = vmatpush3.bf16.msra.mxu0 %v2571_v41 }
 0x2cd   :  { %2041 = vmatpush3.bf16.msra.mxu1 %v2571_v41  ;;  %2022 = vmatprep.subr.bf16.mxu0 %v2325_v2 }
 0x2ce   :  { %2042 = vmatprep.subr.bf16.mxu1 %v2578_v45 }
 0x2d0   :  { %2023 = vmatpush3.bf16.msra.mxu0 %v2578_v45 }
 0x2d1   :  { %2043 = vmatpush3.bf16.msra.mxu1 %v2578_v45  ;;  %2024 = vmatprep.subr.bf16.mxu0 %v2325_v2 }
 0x2d2   :  { %2044 = vmatprep.subr.bf16.mxu1 %v2584_v51 }
 0x2d4   :  { %2025 = vmatpush3.bf16.msra.mxu0 %v2584_v51 }
 0x2d5   :  { %2045 = vmatpush3.bf16.msra.mxu1 %v2584_v51  ;;  %2026 = vmatprep.subr.bf16.mxu0 %v2325_v2 }
 0x2d6   :  { %2046 = vmatprep.subr.bf16.mxu1 %v2590_v0 }
 0x2d8   :  { %2027 = vmatpush3.bf16.msra.mxu0 %v2590_v0 }
 0x2d9   :  { %2047 = vmatpush3.bf16.msra.mxu1 %v2590_v0  ;;  %2028 = vmatprep.subr.bf16.mxu0 %v2325_v2  ;;  %v823_v0 = vunpack.c.h.bf16 %v2578_v45 }
 0x2da   :  { %2048 = vmatprep.subr.bf16.mxu1 %v2597_v58 }
 0x2dc   :  { %2029 = vmatpush3.bf16.msra.mxu0 %v2597_v58 }
 0x2dd   :  { %2049 = vmatpush3.bf16.msra.mxu1 %v2597_v58  ;;  %2030 = vmatprep.subr.bf16.mxu0 %v2325_v2 }
 0x2de   :  { %2050 = vmatprep.subr.bf16.mxu1 %v2604_v62 }
 0x2e0   :  { %2031 = vmatpush3.bf16.msra.mxu0 %v2604_v62 }
 0x2e1   :  { %2051 = vmatpush3.bf16.msra.mxu1 %v2604_v62  ;;  %2032 = vmatprep.subr.bf16.mxu0 %v2325_v2 }
 0x2e2   :  { %2052 = vmatprep.subr.bf16.mxu1 %v2610_v7 }
 0x2e4   :  { %2033 = vmatpush3.bf16.msra.mxu0 %v2610_v7 }
 0x2e5   :  { %2053 = vmatpush3.bf16.msra.mxu1 %v2610_v7  ;;  %2070 = vmatprep.subr.bf16.mxu0 %v2213_v8 }
 0x2e7   :  { %2035 = vmatmul.mubr.bf16.vlgmr.msra.gmra.mxu0 %v2477_v12  ;;  %v2219_v12 = vld [vmem:[#allocation5 + $0x48] sm:$0xff]  }
 0x2e8   :  { %2055 = vmatmul.mubr.bf16.vlgmr.msra.gmra.mxu1 %v2472_v11  ;;  %2071 = vmatpush3.bf16.msra.mxu0 %v2213_v8  ;;  %v2218_v11 = vld [vmem:[#allocation5 + $0x50] sm:$0xff]   ;;  %v822_v8 = vunpack.c.l.bf16 %v2578_v45  ;;  %v827_v45 = vunpack.c.h.bf16 %v2569_v36 }
 0x2e9   :  { %2058 = vmatprep.mubr.bf16.mxu1 %v2482_v13  ;;  %2072 = vmatprep.subr.bf16.mxu0 %v2214_v10  ;;  %v2220_v13 = vld [vmem:[#allocation5 + $0x40] sm:$0xff]   ;;  %v2226_v36 = vld [vmem:[#allocation6 + $0x50] sm:$0xff]  }
 0x2ea   :  { %v844_v26 = vmul.f32 %v2630_v23, %v827_v45 }
 0x2ec   :  { %2073 = vmatpush3.bf16.msra.mxu0 %v2214_v10 }
 0x2ed   :  { %2074 = vmatprep.subr.bf16.mxu0 %v2215_v6 }
 0x2f0   :  { %2059 = vmatmul.mubr.bf16.gmra.mxu1 %v2492_v16  ;;  %2075 = vmatpush3.bf16.msra.mxu0 %v2215_v6  ;;  %v2221_v16 = vld [vmem:[#allocation6 + $0x78] sm:$0xff]   ;;  %v840_v6 = vmul.f32 %v2630_v23, %v823_v0 }
 0x2f1   :  { %2062 = vmatprep.mubr.bf16.mxu1 %v2497_v17  ;;  %2076 = vmatprep.subr.bf16.mxu0 %v2216_v14  ;;  %v2222_v17 = vld [vmem:[#allocation6 + $0x70] sm:$0xff]  }
 0x2f2   :  { %2102 = vmatprep.subr.bf16.mxu1 %v2221_v16 }
 0x2f3   :  { %2103 = vmatpush3.bf16.msra.mxu1 %v2221_v16 }
 0x2f4   :  { %2077 = vmatpush3.bf16.msra.mxu0 %v2216_v14  ;;  %2104 = vmatprep.subr.bf16.mxu1 %v2222_v17 }
 0x2f5   :  { %2078 = vmatprep.subr.bf16.mxu0 %v2217_v60 }
 0x2f7   :  { %2105 = vmatpush3.bf16.msra.mxu1 %v2222_v17 }
 0x2f8   :  { %2063 = vmatmul.mubr.bf16.gmra.mxu1 %v2504_v20  ;;  %2079 = vmatpush3.bf16.msra.mxu0 %v2217_v60  ;;  %v2223_v20 = vld [vmem:[#allocation6 + $0x68] sm:$0xff]   ;;  %v837_v60 = vmul.f32 %v2630_v23, %v820_v63 }
 0x2f9   :  { %2066 = vmatprep.mubr.bf16.mxu1 %v2509_v21  ;;  %2080 = vmatprep.subr.bf16.mxu0 %v2218_v11  ;;  %v2224_v21 = vld [vmem:[#allocation6 + $0x60] sm:$0xff]  }
 0x2fa   :  { %2106 = vmatprep.subr.bf16.mxu1 %v2223_v20 }
 0x2fb   :  { %2107 = vmatpush3.bf16.msra.mxu1 %v2223_v20 }
 0x2fc   :  { %2081 = vmatpush3.bf16.msra.mxu0 %v2218_v11  ;;  %2108 = vmatprep.subr.bf16.mxu1 %v2224_v21  ;;  %v838_v11 = vmul.f32 %v2630_v23, %v821_v9 }
 0x2fd   :  { %2082 = vmatprep.subr.bf16.mxu0 %v2219_v12 }
 0x2ff   :  { %2109 = vmatpush3.bf16.msra.mxu1 %v2224_v21 }
 0x300   :  { %2067 = vmatmul.mubr.bf16.gmra.mxu1 %v2516_v22  ;;  %2083 = vmatpush3.bf16.msra.mxu0 %v2219_v12  ;;  %v2225_v22 = vld [vmem:[#allocation6 + $0x58] sm:$0xff]   ;;  %v839_v12 = vmul.f32 %v2630_v23, %v822_v8  ;;  %v2232_v8 = vld [vmem:[%s2805_s8 + $0x30] sm:$0xff]  }
 0x301   :  { %2084 = vmatprep.subr.bf16.mxu0 %v2220_v13  ;;  %2110 = vmatprep.subr.bf16.mxu1 %v2225_v22 }
 0x303   :  { %2111 = vmatpush3.bf16.msra.mxu1 %v2225_v22 }
 0x304   :  { %2085 = vmatpush3.bf16.msra.mxu0 %v2220_v13  ;;  %2112 = vmatprep.subr.bf16.mxu1 %v2226_v36 }
 0x305   :  { %2134 = vmatprep.subr.bf16.mxu0 %v2325_v2 }
 0x307   :  { %2113 = vmatpush3.bf16.msra.mxu1 %v2226_v36 }
 0x3a7   :  { %v2627_v15 = vpop.f32.mrf.mxu0 }
 0x3a8   :  { %v2056_v18 = vpop.f32.mrf.mxu1 }
 0x3a9   :  { %v2036_v4 = vpop.f32.mrf.mxu0  ;;  %v888_v40 = vadd.f32 %v2056_v18, %v831_v5  ;;  %v824_v18 = vunpack.c.l.bf16 %v2571_v41 }
 0x3aa   :  { %v879_v27 = vpop.f32.mrf.mxu1 }
 0x3ab   :  { %v807_v28 = vpop.f32.mrf.mxu0  ;;  %v880_v38 = vadd.f32 %v879_v27, %v829_v31 }
 0x3ac   :  { %v2057_v30 = vpop.f32.mrf.mxu1  ;;  %v841_v28 = vmul.f32 %v2630_v23, %v824_v18 }
 0x3ad   :  { %v2037_v33 = vpop.f32.mrf.mxu0  ;;  %v891_v35 = vadd.f32 %v2057_v30, %v832_v29  ;;  %v842_v29 = vmul.f32 %v2630_v23, %v825_v19  ;;  %v843_v30 = vmul.f32 %v2630_v23, %v826_v25  ;;  %v2229_v23 = vld [vmem:[%s2805_s8 + $0x78] sm:$0xff]   ;;  %v2236_v25 = vld [vmem:[%s2805_s8 + $0x20] sm:$0xff]  }
 0x3ae   :  { %v882_v3 = vpop.f32.mrf.mxu1 }
 0x3af   :  { %v883_v39 = vadd.f32 %v882_v3, %v830_v32  ;;  %v943_v48 = vpack.c.bf16 %v891_v35, %v888_v40 }
 0x3b0   :  { %v2060_v42 = vpop.f32.mrf.mxu1 }
 0x3b1   :  { %v942_v44 = vpack.c.bf16 %v883_v39, %v880_v38  ;;  %v904_v58 = vadd.f32 %v2060_v42, %v835_v55  ;;  %v2227_v38 = vld [vmem:[#allocation6 + $0x48] sm:$0xff]   ;;  %v2228_v39 = vld [vmem:[#allocation6 + $0x40] sm:$0xff]  }
 0x3b2   :  { %v895_v50 = vpop.f32.mrf.mxu1  ;;  %2114 = vmatprep.subr.bf16.mxu1 %v2227_v38 }
 0x3b3   :  { %2086 = vmatprep.mubr.bf16.mxu0 %v942_v44  ;;  %v896_v37 = vadd.f32 %v895_v50, %v833_v53  ;;  %2115 = vmatpush3.bf16.msra.mxu1 %v2227_v38 }
 0x3b4   :  { %v2061_v52 = vpop.f32.mrf.mxu1  ;;  %2087 = vmatmul.mubr.bf16.vlgmr.msra.gmra.mxu0 %v943_v48  ;;  %2116 = vmatprep.subr.bf16.mxu1 %v2228_v39 }
 0x3b5   :  { %v907_v56 = vadd.f32 %v2061_v52, %v836_v1 }
 0x3b6   :  { %v898_v57 = vpop.f32.mrf.mxu1 }
 0x3b7   :  { %v899_v59 = vadd.f32 %v898_v57, %v834_v54  ;;  %v945_v7 = vpack.c.bf16 %v907_v56, %v904_v58  ;;  %2117 = vmatpush3.bf16.msra.mxu1 %v2228_v39 }
 0x3b8   :  { %v2064_v61 = vpop.f32.mrf.mxu1  ;;  %1871 = vmatprep.subr.bf16.mxu1 %v2229_v23 }
 0x3b9   :  { %v944_v62 = vpack.c.bf16 %v899_v59, %v896_v37  ;;  %v920_v51 = vadd.f32 %v2064_v61, %v839_v12  ;;  %v2230_v37 = vld [vmem:[%s2805_s8 + $0x38] sm:$0xff]   ;;  %v2231_v61 = vld [vmem:[%s2805_s8 + $0x70] sm:$0xff]  }
 0x3ba   :  { %v911_v10 = vpop.f32.mrf.mxu1 }
 0x3bb   :  { %2090 = vmatprep.mubr.bf16.mxu0 %v944_v62  ;;  %v912_v17 = vadd.f32 %v911_v10, %v837_v60 }
 0x3bc   :  { %v2065_v14 = vpop.f32.mrf.mxu1  ;;  %2091 = vmatmul.mubr.bf16.gmra.mxu0 %v945_v7 }
 0x3bd   :  { %v923_v13 = vadd.f32 %v2065_v14, %v840_v6  ;;  %v2233_v14 = vld [vmem:[%s2805_s8 + $0x68] sm:$0xff]  }
 0x3be   :  { %v914_v16 = vpop.f32.mrf.mxu1 }
 0x3bf   :  { %v915_v20 = vadd.f32 %v914_v16, %v838_v11  ;;  %v947_v24 = vpack.c.bf16 %v923_v13, %v920_v51 }
 0x3c0   :  { %v2068_v21 = vpop.f32.mrf.mxu1 }
 0x3c1   :  { %v946_v22 = vpack.c.bf16 %v915_v20, %v912_v17  ;;  %v936_v41 = vadd.f32 %v2068_v21, %v843_v30  ;;  %v2234_v17 = vld [vmem:[%s2805_s8 + $0x28] sm:$0xff]   ;;  %v2235_v21 = vld [vmem:[%s2805_s8 + $0x60] sm:$0xff]  }
 0x3c2   :  { %v927_v4 = vpop.f32.mrf.mxu1 }
 0x3c3   :  { %2094 = vmatprep.mubr.bf16.mxu0 %v946_v22  ;;  %v928_v33 = vadd.f32 %v927_v4, %v841_v28 }
 0x3c4   :  { %v2069_v27 = vpop.f32.mrf.mxu1  ;;  %2095 = vmatmul.mubr.bf16.gmra.mxu0 %v947_v24 }
 0x3c5   :  { %v939_v31 = vadd.f32 %v2069_v27, %v844_v26  ;;  %v2237_v27 = vld [vmem:[%s2805_s8 + $0x58] sm:$0xff]  }
 0x3c6   :  { %v930_v32 = vpop.f32.mrf.mxu1 }
 0x3c7   :  { %v931_v5 = vadd.f32 %v930_v32, %v842_v29  ;;  %v949_v3 = vpack.c.bf16 %v939_v31, %v936_v41 }
 0x3c9   :  { %v948_v35 = vpack.c.bf16 %v931_v5, %v928_v33  ;;  %v2238_v33 = vld [vmem:[%s2805_s8 + $0x18] sm:$0xff]  }
 0x3cb   :  { %2098 = vmatprep.mubr.bf16.mxu0 %v948_v35  ;;  %v2239_v35 = vld [vmem:[%s2805_s8 + $0x50] sm:$0xff]  }
 0x3cc   :  { %2099 = vmatmul.mubr.bf16.gmra.mxu0 %v949_v3 }
 0x3cd   :  { %2150 = vmatprep.mubr.msk.bf16.mxu0 %vm2326_vm0, %v2325_v2 }
 0x474   :  { %v2088_v40 = vpop.f32.mrf.mxu0 }
 0x475   :  { %v1066_v48 = vadd.f32 %v2088_v40, %v2671_v43  ;;  %v2240_v40 = vld [vmem:[%s2805_s8 + $0x10] sm:$0xff]  }
 0x476   :  { %v1057_v42 = vpop.f32.mrf.mxu0 }
 0x477   :  { %v1058_v46 = vadd.f32 %v2671_v43, %v1057_v42  ;;  %v1122_v55 = vmax.f32 %v1066_v48, 0.0 }
 0x478   :  { %v2089_v44 = vpop.f32.mrf.mxu0 }
 0x479   :  { %v1069_v47 = vadd.f32 %v2089_v44, %v2671_v43  ;;  %v1120_v53 = vmax.f32 %v1058_v46, 0.0  ;;  %v2241_v44 = vld [vmem:[%s2805_s8 + $0x48] sm:$0xff]  }
 0x47a   :  { %v1060_v49 = vpop.f32.mrf.mxu0 }
 0x47b   :  { %v1061_v50 = vadd.f32 %v2671_v43, %v1060_v49  ;;  %v1123_v1 = vmax.f32 %v1069_v47, 0.0 }
 0x47c   :  { %v2092_v52 = vpop.f32.mrf.mxu0 }
 0x47d   :  { %v1121_v54 = vmax.f32 %v1061_v50, 0.0  ;;  %v1137_v59 = vpack.c.bf16 %v1123_v1, %v1122_v55  ;;  %v1082_v63 = vadd.f32 %v2092_v52, %v2671_v43  ;;  %v2243_v1 = vld [vmem:[%s2805_s8 + $0x40] sm:$0xff]   ;;  %v1379_v52 = vpack.c.bf16 %v2627_v15, %v2627_v15 }
 0x47e   :  { %v1073_v56 = vpop.f32.mrf.mxu0 }
 0x47f   :  { %v1136_v57 = vpack.c.bf16 %v1121_v54, %v1120_v53  ;;  %v1074_v0 = vadd.f32 %v2671_v43, %v1073_v56  ;;  %v1126_v12 = vmax.f32 %v1082_v63, 0.0  ;;  %v2244_v53 = vld [vmem:[%s2805_s8] sm:$0xff]   ;;  %v1378_v54 = vpack.c.bf16 %v2523_v34, %v2523_v34 }
 0x480   :  { %v2093_v58 = vpop.f32.mrf.mxu0 }
 0x481   :  { %v1085_v62 = vadd.f32 %v2093_v58, %v2671_v43  ;;  %2118 = vmatprep.mubr.bf16.mxu1 %v1136_v57  ;;  %v1124_v60 = vmax.f32 %v1074_v0, 0.0 }
 0x482   :  { %v1076_v9 = vpop.f32.mrf.mxu0  ;;  %2119 = vmatmul.mubr.bf16.vlgmr.msra.gmra.mxu1 %v1137_v59 }
 0x483   :  { %v1077_v7 = vadd.f32 %v2671_v43, %v1076_v9  ;;  %1872 = vmatpush3.bf16.msra.mxu1 %v2230_v37  ;;  %v1127_v10 = vmax.f32 %v1085_v62, 0.0 }
 0x484   :  { %v2096_v6 = vpop.f32.mrf.mxu0  ;;  %1873 = vmatprep.subr.bf16.mxu1 %v2231_v61 }
 0x485   :  { %v1125_v11 = vmax.f32 %v1077_v7, 0.0  ;;  %v1139_v20 = vpack.c.bf16 %v1127_v10, %v1126_v12  ;;  %v1098_v18 = vadd.f32 %v2096_v6, %v2671_v43 }
 0x486   :  { %v1089_v13 = vpop.f32.mrf.mxu0 }
 0x487   :  { %v1138_v16 = vpack.c.bf16 %v1125_v11, %v1124_v60  ;;  %1874 = vmatpush3.bf16.msra.mxu1 %v2232_v8  ;;  %v1090_v45 = vadd.f32 %v2671_v43, %v1089_v13  ;;  %v1130_v30 = vmax.f32 %v1098_v18, 0.0  ;;  %v1714_v8 = vld [vmem:[%s2804_s7 + $0x1] ss:$0 sm:$0xff] }
 0x488   :  { %v2097_v51 = vpop.f32.mrf.mxu0  ;;  %1875 = vmatprep.subr.bf16.mxu1 %v2233_v14 }
 0x489   :  { %v1101_v22 = vadd.f32 %v2097_v51, %v2671_v43  ;;  %2122 = vmatprep.mubr.bf16.mxu1 %v1138_v16  ;;  %v1128_v28 = vmax.f32 %v1090_v45, 0.0 }
 0x48a   :  { %v1092_v19 = vpop.f32.mrf.mxu0  ;;  %2123 = vmatmul.mubr.bf16.gmra.mxu1 %v1139_v20 }
 0x48b   :  { %v1093_v24 = vadd.f32 %v2671_v43, %v1092_v19  ;;  %1876 = vmatpush3.bf16.msra.mxu1 %v2234_v17  ;;  %v1131_v4 = vmax.f32 %v1101_v22, 0.0 }
 0x48c   :  { %v2100_v26 = vpop.f32.mrf.mxu0  ;;  %1877 = vmatprep.subr.bf16.mxu1 %v2235_v21 }
 0x48d   :  { %v1129_v29 = vmax.f32 %v1093_v24, 0.0  ;;  %v1141_v5 = vpack.c.bf16 %v1131_v4, %v1130_v30  ;;  %v1114_v38 = vadd.f32 %v2100_v26, %v2671_v43 }
 0x48e   :  { %v1105_v31 = vpop.f32.mrf.mxu0 }
 0x48f   :  { %v1140_v32 = vpack.c.bf16 %v1129_v29, %v1128_v28  ;;  %1878 = vmatpush3.bf16.msra.mxu1 %v2236_v25  ;;  %v1106_v3 = vadd.f32 %v2671_v43, %v1105_v31  ;;  %v1134_v48 = vmax.f32 %v1114_v38, 0.0 }
 0x490   :  { %v2101_v41 = vpop.f32.mrf.mxu0  ;;  %1879 = vmatprep.subr.bf16.mxu1 %v2237_v27 }
 0x491   :  { %v1117_v36 = vadd.f32 %v2101_v41, %v2671_v43  ;;  %2126 = vmatprep.mubr.bf16.mxu1 %v1140_v32  ;;  %v1132_v46 = vmax.f32 %v1106_v3, 0.0 }
 0x492   :  { %v1108_v39 = vpop.f32.mrf.mxu0  ;;  %2127 = vmatmul.mubr.bf16.gmra.mxu1 %v1141_v5 }
 0x493   :  { %v1109_v23 = vadd.f32 %v2671_v43, %v1108_v39  ;;  %1880 = vmatpush3.bf16.msra.mxu1 %v2238_v33  ;;  %v1135_v42 = vmax.f32 %v1117_v36, 0.0  ;;  %v2242_v43 = vld [vmem:[%s2805_s8 + $0x8] sm:$0xff]  }
 0x494   :  { %1881 = vmatprep.subr.bf16.mxu1 %v2239_v35 }
 0x495   :  { %v1133_v47 = vmax.f32 %v1109_v23, 0.0  ;;  %v1143_v50 = vpack.c.bf16 %v1135_v42, %v1134_v48 }
 0x497   :  { %v1142_v49 = vpack.c.bf16 %v1133_v47, %v1132_v46  ;;  %1882 = vmatpush3.bf16.msra.mxu1 %v2240_v40 }
 0x498   :  { %1883 = vmatprep.subr.bf16.mxu1 %v2241_v44 }
 0x499   :  { %2130 = vmatprep.mubr.bf16.mxu1 %v1142_v49 }
 0x49a   :  { %2131 = vmatmul.mubr.bf16.gmra.mxu1 %v1143_v50 }
 0x49b   :  { %1884 = vmatpush3.bf16.msra.mxu1 %v2242_v43  ;;  %1612 = vmatprep.mubr.bf16.mxu1 %v1379_v52 }
 0x49c   :  { %1885 = vmatprep.subr.bf16.mxu1 %v2243_v1 }
 0x49f   :  { %1886 = vmatpush3.bf16.msra.mxu1 %v2244_v53 }
 0x4a2   :  { %1613 = vmatmul.mubr.bf16.vlgmr.msra.gmra.mxu1 %v1378_v54  ;;  %v2245_v54 = vld [vmem:[%s2805_s8 + $0xb8] sm:$0xff]  }
 0x542   :  { %v2120_v55 = vpop.f32.mrf.mxu1 }
 0x543   :  { %v1260_v42 = vadd.f32 %v2120_v55, %v1714_v8  ;;  %v2261_v55 = vld [vmem:[%s2799_s2] sm:$0xf] }
 0x544   :  { %v2738_v56 = vpop.f32.mrf.mxu1 }
 0x545   :  { %v1316_v49 = vmax.f32 %v1260_v42, 0.0  ;;  %v1252_v43 = vadd.f32 %v1714_v8, %v2738_v56  ;;  %v2246_v56 = vld [vmem:[%s2805_s8 + $0xb0] sm:$0xff]  }
 0x546   :  { %v2121_v57 = vpop.f32.mrf.mxu1 }
 0x547   :  { %v1263_v39 = vadd.f32 %v2121_v57, %v1714_v8  ;;  %v1314_v52 = vmax.f32 %v1252_v43, 0.0  ;;  %v2247_v57 = vld [vmem:[%s2805_s8 + $0xa8] sm:$0xff]  }
 0x548   :  { %v1254_v37 = vpop.f32.mrf.mxu1 }
 0x549   :  { %v1317_v46 = vmax.f32 %v1263_v39, 0.0  ;;  %v1255_v47 = vadd.f32 %v1714_v8, %v1254_v37  ;;  %v2248_v37 = vld [vmem:[%s2805_s8 + $0xa0] sm:$0xff]  }
 0x54a   :  { %v2124_v15 = vpop.f32.mrf.mxu1 }
 0x54b   :  { %v1276_v33 = vadd.f32 %v2124_v15, %v1714_v8  ;;  %v1331_v50 = vpack.c.bf16 %v1317_v46, %v1316_v49  ;;  %v1315_v1 = vmax.f32 %v1255_v47, 0.0  ;;  %v2249_v15 = vld [vmem:[%s2805_s8 + $0x98] sm:$0xff]  }
 0x54c   :  { %v1267_v59 = vpop.f32.mrf.mxu1 }
 0x54d   :  { %v1320_v36 = vmax.f32 %v1276_v33, 0.0  ;;  %v1268_v38 = vadd.f32 %v1714_v8, %v1267_v59  ;;  %v1330_v53 = vpack.c.bf16 %v1315_v1, %v1314_v52  ;;  %v2250_v59 = vld [vmem:[%s2805_s8 + $0x90] sm:$0xff]  }
 0x54e   :  { %v2125_v58 = vpop.f32.mrf.mxu1 }
 0x54f   :  { %v1279_v30 = vadd.f32 %v2125_v58, %v1714_v8  ;;  %v1318_v44 = vmax.f32 %v1268_v38, 0.0  ;;  %v2251_v58 = vld [vmem:[%s2805_s8 + $0x88] sm:$0xff]  }
 0x550   :  { %v1270_v61 = vpop.f32.mrf.mxu1 }
 0x551   :  { %v1321_v41 = vmax.f32 %v1279_v30, 0.0  ;;  %v1271_v35 = vadd.f32 %v1714_v8, %v1270_v61  ;;  %v2252_v61 = vld [vmem:[%s2805_s8 + $0x80] sm:$0xff]  }
 0x552   :  { %v2128_v0 = vpop.f32.mrf.mxu1 }
 0x553   :  { %v1292_v22 = vadd.f32 %v2128_v0, %v1714_v8  ;;  %v1333_v23 = vpack.c.bf16 %v1321_v41, %v1320_v36  ;;  %v1319_v40 = vmax.f32 %v1271_v35, 0.0 }
 0x554   :  { %v1283_v62 = vpop.f32.mrf.mxu1 }
 0x555   :  { %v1324_v28 = vmax.f32 %v1292_v22, 0.0  ;;  %v1284_v29 = vadd.f32 %v1714_v8, %v1283_v62  ;;  %v1332_v48 = vpack.c.bf16 %v1319_v40, %v1318_v44 }
 0x556   :  { %v2129_v63 = vpop.f32.mrf.mxu1 }
 0x557   :  { %v1295_v20 = vadd.f32 %v2129_v63, %v1714_v8  ;;  %v1322_v5 = vmax.f32 %v1284_v29, 0.0 }
 0x558   :  { %v1286_v9 = vpop.f32.mrf.mxu1 }
 0x559   :  { %v1325_v25 = vmax.f32 %v1295_v20, 0.0  ;;  %v1287_v4 = vadd.f32 %v1714_v8, %v1286_v9 }
 0x55a   :  { %v2132_v7 = vpop.f32.mrf.mxu1 }
 0x55b   :  { %v1308_v10 = vadd.f32 %v2132_v7, %v1714_v8  ;;  %v1335_v31 = vpack.c.bf16 %v1325_v25, %v1324_v28  ;;  %v1323_v32 = vmax.f32 %v1287_v4, 0.0 }
 0x55c   :  { %v1299_v34 = vpop.f32.mrf.mxu1 }
 0x55d   :  { %v1328_v11 = vmax.f32 %v1308_v10, 0.0  ;;  %v1300_v12 = vadd.f32 %v1714_v8, %v1299_v34  ;;  %v1334_v3 = vpack.c.bf16 %v1323_v32, %v1322_v5 }
 0x55e   :  { %v2133_v6 = vpop.f32.mrf.mxu1 }
 0x55f   :  { %v1311_v14 = vadd.f32 %v2133_v6, %v1714_v8  ;;  %v1326_v18 = vmax.f32 %v1300_v12, 0.0 }
 0x560   :  { %v1302_v60 = vpop.f32.mrf.mxu1 }
 0x561   :  { %v1329_v13 = vmax.f32 %v1311_v14, 0.0  ;;  %v1303_v16 = vadd.f32 %v1714_v8, %v1302_v60  ;;  %v1723_v8 = vld [vmem:[%s2806_s9] ss:$0 sm:$0xff] }
 0x562   :  { %v1887_v17 = vpop.f32.mrf.mxu1 }
 0x563   :  { %v1337_v51 = vpack.c.bf16 %v1329_v13, %v1328_v11  ;;  %v1327_v21 = vmax.f32 %v1303_v16, 0.0 }
 0x564   :  { %v1888_v45 = vpop.f32.mrf.mxu1 }
 0x565   :  { %v2743_v19 = vadd.f32 %v1888_v45, %v1887_v17  ;;  %2135 = vmatpush3.bf16.msra.mxu0 %v1337_v51  ;;  %v1336_v26 = vpack.c.bf16 %v1327_v21, %v1326_v18 }
 0x566   :  { %v1890_v24 = vpop.f32.mrf.mxu1  ;;  %2136 = vmatprep.subr.bf16.mxu0 %v2325_v2 }
 0x567   :  { %v1615_v34 = vadd.f32 %v2743_v19, %v1723_v8 }
 0x568   :  { %v1891_v27 = vpop.f32.mrf.mxu1 }
 0x569   :  { %2137 = vmatpush3.bf16.msra.mxu0 %v1336_v26 }
 0x56a   :  { %2138 = vmatprep.subr.bf16.mxu0 %v2325_v2 }
 0x56d   :  { %2139 = vmatpush3.bf16.msra.mxu0 %v1335_v31 }
 0x56e   :  { %2140 = vmatprep.subr.bf16.mxu0 %v2325_v2 }
 0x571   :  { %2141 = vmatpush3.bf16.msra.mxu0 %v1334_v3 }
 0x572   :  { %2142 = vmatprep.subr.bf16.mxu0 %v2325_v2 }
 0x575   :  { %2143 = vmatpush3.bf16.msra.mxu0 %v1333_v23 }
 0x576   :  { %2144 = vmatprep.subr.bf16.mxu0 %v2325_v2 }
 0x579   :  { %2145 = vmatpush3.bf16.msra.mxu0 %v1332_v48 }
 0x57a   :  { %2146 = vmatprep.subr.bf16.mxu0 %v2325_v2 }
 0x57d   :  { %2147 = vmatpush3.bf16.msra.mxu0 %v1331_v50 }
 0x57e   :  { %2148 = vmatprep.subr.bf16.mxu0 %v2325_v2 }
 0x581   :  { %2149 = vmatpush3.bf16.msra.mxu0 %v1330_v53 }
 0x582   :  { %2154 = vmatprep.subr.bf16.mxu0 %v2325_v2 }
 0x584   :  { %2151 = vmatmul.mubr.bf16.vlgmr.msra.gmra.mxu0 %v2261_v55 }
 0x585   :  { %2155 = vmatpush3.bf16.msra.mxu0 %v2245_v54  ;;  %2170 = vmatprep.mubr.msk.bf16.mxu0 %vm2326_vm0, %v2325_v2 }
 0x586   :  { %2156 = vmatprep.subr.bf16.mxu0 %v2325_v2 }
 0x589   :  { %2157 = vmatpush3.bf16.msra.mxu0 %v2246_v56 }
 0x58a   :  { %2158 = vmatprep.subr.bf16.mxu0 %v2325_v2 }
 0x58d   :  { %2159 = vmatpush3.bf16.msra.mxu0 %v2247_v57 }
 0x58e   :  { %2160 = vmatprep.subr.bf16.mxu0 %v2325_v2 }
 0x591   :  { %2161 = vmatpush3.bf16.msra.mxu0 %v2248_v37 }
 0x592   :  { %2162 = vmatprep.subr.bf16.mxu0 %v2325_v2 }
 0x595   :  { %2163 = vmatpush3.bf16.msra.mxu0 %v2249_v15 }
 0x596   :  { %2164 = vmatprep.subr.bf16.mxu0 %v2325_v2 }
 0x599   :  { %2165 = vmatpush3.bf16.msra.mxu0 %v2250_v59 }
 0x59a   :  { %2166 = vmatprep.subr.bf16.mxu0 %v2325_v2 }
 0x59d   :  { %2167 = vmatpush3.bf16.msra.mxu0 %v2251_v58 }
 0x59e   :  { %2168 = vmatprep.subr.bf16.mxu0 %v2325_v2 }
 0x5a1   :  { %2169 = vmatpush3.bf16.msra.mxu0 %v2252_v61 }
 0x644   :  { %v1372_v0 = vpop.f32.mrf.mxu0 }
 0x645   :  { %v1380_v62 = vpack.c.bf16 %v1372_v0, %v1372_v0 }
 0x646   :  { %v2152_v63 = vpop.f32.mrf.mxu0 }
 0x647   :  { %2171 = vmatmul.mubr.bf16.vlgmr.msra.gmra.mxu0 %v1380_v62 }
 0x648   :  { %v1375_v9 = vpop.f32.mrf.mxu0 }
 0x64a   :  { %v2153_v7 = vpop.f32.mrf.mxu0 }
 0x707   :  { %v1654_v10 = vpop.f32.mrf.mxu0 }
 0x708   :  { %v1655_v6 = vadd.f32 %v1654_v10, %v1615_v34 }
 0x709   :  { %v2172_v2 = vpop.f32.mrf.mxu0 }
 0x70a   :  { %1660 = vst [vmem:[%s2807_s10] sm:$0xff] %v1655_v6 }
 0x70b   :  { %v1657_v14 = vpop.f32.mrf.mxu0 }
 0x70d   :  { %v2173_v60 = vpop.f32.mrf.mxu0 }
 0x70e   :  { %1665 = vsyncpa [#allocation3], 1 }
 0x70f   :  { %1666 = vsyncpa [#allocation7], 1 }
 0x710   :  { %1667 = vsyncpa [#allocation4], 1 }

</bundles_post_ra>
